<compile_context>
chip_gen: v7x
topology: tpu7x:2x2x1
jax: 0.10.0
libtpu: 0.0.40
codegen_flags: <defaults>
</compile_context>

<pallas_src>
import math

import jax
import jax.numpy as jnp
from jax.experimental import pallas as pl
from jax.experimental.pallas import tpu as pltpu


def _flatten_linear_kernel(x_ref, w_ref, b_ref, o_ref):
    # x_ref: (tm, K) activations, w_ref: (K, N) pre-transposed weight,
    # b_ref: (1, N) bias, o_ref: (tm, N) output.  MXU matmul, f32 accumulate.
    acc = jnp.dot(x_ref[...], w_ref[...], preferred_element_type=jnp.float32)
    o_ref[...] = (acc + b_ref[...]).astype(o_ref.dtype)


def _round_up(x, m):
    return ((x + m - 1) // m) * m


def _pick_tile(B, tm_max=2048):
    """Batch tile: multiple of 8, capped at tm_max, >=2 grid steps when B is big."""
    if B <= 8:
        return _round_up(B, 8)                 # single 8-sublane-aligned tile
    if B <= 2 * tm_max:
        # Split into at least 2 grid steps so both v7x TensorCores get work.
        return min(tm_max, _round_up(pl.cdiv(B, 2), 8))
    return tm_max


def flatten_linear(x, weight, bias):
    """Forward pass of Model: flatten(x) @ weight.T + bias.

    x:      (B, C, H, W) float32
    weight: (N, K)       float32  (native PyTorch nn.Linear layout, K = C*H*W)
    bias:   (N,)         float32
    returns (B, N)       float32
    """
    B = x.shape[0]
    K = math.prod(x.shape[1:])          # static Python int (nn.Flatten size)
    N = weight.shape[0]

    x2d = x.reshape(B, K)               # nn.Flatten(start_dim=1)
    w_t = weight.T                      # one-time (K, N) layout for the MXU
    b2d = bias.reshape(1, N)            # 2-D for a clean TPU block layout

    tm = _pick_tile(B)
    grid = (pl.cdiv(B, tm),)

    cost = pl.CostEstimate(
        flops=2 * B * K * N,
        transcendentals=0,
        bytes_accessed=4 * (B * K + K * N + B * N),
    )

    out = pl.pallas_call(
        _flatten_linear_kernel,
        out_shape=jax.ShapeDtypeStruct((B, N), jnp.float32),
        grid=grid,
        in_specs=[
            pl.BlockSpec((tm, K), lambda i: (i, 0)),   # activations, tiled over B
            pl.BlockSpec((K, N), lambda i: (0, 0)),    # weight (K, N), resident
            pl.BlockSpec((1, N), lambda i: (0, 0)),    # bias, resident
        ],
        out_specs=pl.BlockSpec((tm, N), lambda i: (i, 0)),
        compiler_params=pltpu.CompilerParams(
            dimension_semantics=("parallel",),         # B tiles are independent
            vmem_limit_bytes=32 << 20,                 # tm=2048 safe incl. v5e
        ),
        cost_estimate=cost,
    )(x2d, w_t, b2d)
    return out


if __name__ == "__main__":
    # Small shapes consistent with the module: batch=2, channels=4, spatial=16.
    B, C, H, W = 2, 4, 16, 16
    input_size = C * H * W      # 1024
    output_size = 10

    key = jax.random.PRNGKey(0)
    kx, kw, kb = jax.random.split(key, 3)

    x = jax.random.normal(kx, (B, C, H, W), dtype=jnp.float32)

    # Deterministic parameter init mirroring nn.Linear's uniform(-1/sqrt(K), 1/sqrt(K)).
    bound = 1.0 / math.sqrt(input_size)
    weight = jax.random.uniform(kw, (output_size, input_size),
                                dtype=jnp.float32, minval=-bound, maxval=bound)
    bias = jax.random.uniform(kb, (output_size,),
                              dtype=jnp.float32, minval=-bound, maxval=bound)

    y = flatten_linear(x, weight, bias)
    jax.block_until_ready(y)

    # Cross-check against the plain-JAX reference of the same forward pass.
    y_ref = x.reshape(B, -1) @ weight.T + bias
    assert y.shape == (B, output_size)
    assert jnp.allclose(y, y_ref, atol=1e-5, rtol=1e-5)

    print("KERNEL_OK")
</pallas_src>

<mosaic_0001>
module attributes {stable_mosaic.version = 11 : i64} {
  func.func @_flatten_linear_kernel(%arg0: i32, %arg1: memref<8x1024xf32, #tpu.memory_space<vmem>>, %arg2: memref<1024x10xf32, #tpu.memory_space<vmem>>, %arg3: memref<1x10xf32, #tpu.memory_space<vmem>>, %arg4: memref<8x10xf32, #tpu.memory_space<vmem>>) attributes {dimension_semantics = [#tpu.dimension_semantics<parallel>], iteration_bounds = array<i64: 1>, scalar_prefetch = 0 : i64, scratch_operands = 0 : i64, tpu.core_type = #tpu.core_type<tc>, window_params = [{transform_indices = @transform_0, window_bounds = array<i64: 8, 1024>}, {pipeline_mode = #tpu.pipeline_mode<synchronous>, transform_indices = @transform_1, window_bounds = array<i64: 1024, 10>}, {pipeline_mode = #tpu.pipeline_mode<synchronous>, transform_indices = @transform_2, window_bounds = array<i64: 1, 10>}, {transform_indices = @transform_3, window_bounds = array<i64: 8, 10>}]} {
    %c0 = arith.constant 0 : index
    %c0_0 = arith.constant 0 : index
    %0 = vector.load %arg1[%c0, %c0_0] : memref<8x1024xf32, #tpu.memory_space<vmem>>, vector<8x1024xf32>
    %c0_1 = arith.constant 0 : index
    %c0_2 = arith.constant 0 : index
    %1 = vector.load %arg2[%c0_1, %c0_2] : memref<1024x10xf32, #tpu.memory_space<vmem>>, vector<1024x10xf32>
    %cst = arith.constant dense<0.000000e+00> : vector<8x10xf32>
    %2 = tpu.matmul %0, %1, %cst {dimension_numbers = #tpu.dot_dimension_numbers<[1], [0], [0], [1], [0, 0, 1, 1], [], []>} : vector<8x1024xf32>, vector<1024x10xf32>, vector<8x10xf32> -> vector<8x10xf32>
    %c0_3 = arith.constant 0 : index
    %c0_4 = arith.constant 0 : index
    %3 = vector.load %arg3[%c0_3, %c0_4] : memref<1x10xf32, #tpu.memory_space<vmem>>, vector<1x10xf32>
    %4 = vector.broadcast %3 : vector<1x10xf32> to vector<8x10xf32>
    %5 = arith.addf %2, %4 : vector<8x10xf32>
    %c0_5 = arith.constant 0 : index
    %c0_6 = arith.constant 0 : index
    %6 = vector.load %arg4[%c0_5, %c0_6] : memref<8x10xf32, #tpu.memory_space<vmem>>, vector<8x10xf32>
    tpu.vector_store %arg4[%c0_5, %c0_6], %5 {strides = array<i32>} : memref<8x10xf32, #tpu.memory_space<vmem>>, vector<8x10xf32>,
    return
  }
  func.func @transform_0(%arg0: i32) -> (i32, i32) {
    %c0_i32 = arith.constant 0 : i32
    %c0_i32_0 = arith.constant 0 : i32
    return %arg0, %c0_i32 : i32, i32
  }
  func.func @transform_1(%arg0: i32) -> (i32, i32) {
    %c0_i32 = arith.constant 0 : i32
    %c0_i32_0 = arith.constant 0 : i32
    %c0_i32_1 = arith.constant 0 : i32
    return %c0_i32, %c0_i32_0 : i32, i32
  }
  func.func @transform_2(%arg0: i32) -> (i32, i32) {
    %c0_i32 = arith.constant 0 : i32
    %c0_i32_0 = arith.constant 0 : i32
    %c0_i32_1 = arith.constant 0 : i32
    return %c0_i32, %c0_i32_0 : i32, i32
  }
  func.func @transform_3(%arg0: i32) -> (i32, i32) {
    %c0_i32 = arith.constant 0 : i32
    %c0_i32_0 = arith.constant 0 : i32
    return %arg0, %c0_i32 : i32, i32
  }
}

</mosaic_0001>

<bundles_post_ra>
// kernel: tpu_custom_call.1
= control target key start
LH: loop header
LB: loop body
LE: loop exit
PB: predicated region body
PF: predicated region fallthrough
CT: control target
= control target key end

     0   :  { %8 = vsyncpa [#allocation3], 0  ;;  %v853_v54 = vmov 1983009808   ;;  %v173_v56 = vlaneseq  ;;  %vm526_vm0 = vcmask 80896   ;;  %s1310_s0 = inlined_call_operand.vmem [shape: f32[2,1024], index: 0, kind: input, shape index: {}]   ;;  %s1311_s1 = inlined_call_operand.vmem [shape: f32[1024,10], index: 1, kind: input, shape index: {}]   ;;  %s1312_s2 = inlined_call_operand.vmem [shape: f32[1,10], index: 2, kind: input, shape index: {}]   ;;  %s1313_s3 = inlined_call_operand.hbm [shape: f32[2,10], index: 3, kind: output, shape index: {}]  }
   0x1   :  { %v39_v0 = vld [vmem:[%s1311_s1 + $0x80] sm:$0xff]  ;;  %v40_v1 = vld [vmem:[%s1311_s1 + $0x88] sm:$0xff]  ;;  %v41_v12 = vld [vmem:[%s1311_s1 + $0x90] sm:$0xff]  ;;  %v171_v55 = vunpack.c.l.s4 %v853_v54 }
   0x2   :  { %v685_v2 = vpack.c.bf16 %v40_v1, %v39_v0  ;;  %v23_v3 = vld [vmem:[%s1311_s1] sm:$0xff]  ;;  %v24_v4 = vld [vmem:[%s1311_s1 + $0x8] sm:$0xff]  ;;  %v42_v13 = vld [vmem:[%s1311_s1 + $0x98] sm:$0xff] }
   0x3   :  { %v71_v5 = vld [vmem:[%s1311_s1 + $0x180] sm:$0xff]  ;;  %v687_v6 = vpack.c.bf16 %v24_v4, %v23_v3  ;;  %v72_v7 = vld [vmem:[%s1311_s1 + $0x188] sm:$0xff]  ;;  %v25_v14 = vld [vmem:[%s1311_s1 + $0x10] sm:$0xff]  ;;  %v689_v15 = vpack.c.bf16 %v42_v13, %v41_v12 }
   0x4   :  { %v55_v8 = vld [vmem:[%s1311_s1 + $0x100] sm:$0xff]  ;;  %v56_v9 = vld [vmem:[%s1311_s1 + $0x108] sm:$0xff]  ;;  %686 = vmatprep.subr.bf16.mxu0 %v685_v2  ;;  %v717_v10 = vpack.c.bf16 %v72_v7, %v71_v5  ;;  %v26_v16 = vld [vmem:[%s1311_s1 + $0x18] sm:$0xff]  ;;  %v172_v5 = vunpack.c.0.s8 %v171_v55 }
   0x5   :  { %v719_v11 = vpack.c.bf16 %v56_v9, %v55_v8  ;;  %688 = vmatpush3.bf16.msra.mxu0 %v687_v6  ;;  %v73_v17 = vld [vmem:[%s1311_s1 + $0x190] sm:$0xff]  ;;  %v74_v18 = vld [vmem:[%s1311_s1 + $0x198] sm:$0xff]  ;;  %v691_v19 = vpack.c.bf16 %v26_v16, %v25_v14  ;;  %v43_v23 = vld [vmem:[%s1311_s1 + $0xa0] sm:$0xff]  ;;  %v174_v6 = vshrl.u32 %v173_v56, 7 }
   0x6   :  { %718 = vmatprep.subr.bf16.mxu1 %v717_v10  ;;  %v721_v20 = vpack.c.bf16 %v74_v18, %v73_v17  ;;  %v57_v21 = vld [vmem:[%s1311_s1 + $0x110] sm:$0xff]  ;;  %v58_v22 = vld [vmem:[%s1311_s1 + $0x118] sm:$0xff]  ;;  %690 = vmatprep.subr.bf16.mxu0 %v689_v15  ;;  %v44_v25 = vld [vmem:[%s1311_s1 + $0xa8] sm:$0xff] }
   0x7   :  { %720 = vmatpush3.bf16.msra.mxu1 %v719_v11  ;;  %v723_v24 = vpack.c.bf16 %v58_v22, %v57_v21  ;;  %v27_v26 = vld [vmem:[%s1311_s1 + $0x20] sm:$0xff]  ;;  %v28_v27 = vld [vmem:[%s1311_s1 + $0x28] sm:$0xff]  ;;  %v693_v28 = vpack.c.bf16 %v44_v25, %v43_v23  ;;  %v45_v35 = vld [vmem:[%s1311_s1 + $0xb0] sm:$0xff]  ;;  %v1051_v23 = vsub.s32 %v172_v5, %v174_v6 }
   0x8   :  { %722 = vmatprep.subr.bf16.mxu1 %v721_v20  ;;  %v75_v29 = vld [vmem:[%s1311_s1 + $0x1a0] sm:$0xff]  ;;  %v76_v30 = vld [vmem:[%s1311_s1 + $0x1a8] sm:$0xff]  ;;  %v695_v32 = vpack.c.bf16 %v28_v27, %v27_v26  ;;  %v46_v36 = vld [vmem:[%s1311_s1 + $0xb8] sm:$0xff] }
   0x9   :  { %v59_v31 = vld [vmem:[%s1311_s1 + $0x120] sm:$0xff]  ;;  %692 = vmatpush3.bf16.msra.mxu0 %v691_v19  ;;  %v725_v33 = vpack.c.bf16 %v76_v30, %v75_v29  ;;  %v60_v34 = vld [vmem:[%s1311_s1 + $0x128] sm:$0xff]  ;;  %v697_v37 = vpack.c.bf16 %v46_v36, %v45_v35  ;;  %v29_v38 = vld [vmem:[%s1311_s1 + $0x30] sm:$0xff] }
   0xa   :  { %694 = vmatprep.subr.bf16.mxu0 %v693_v28  ;;  %v30_v39 = vld [vmem:[%s1311_s1 + $0x38] sm:$0xff]  ;;  %v77_v40 = vld [vmem:[%s1311_s1 + $0x1b0] sm:$0xff]  ;;  %v727_v41 = vpack.c.bf16 %v60_v34, %v59_v31  ;;  %v47_v46 = vld [vmem:[%s1311_s1 + $0xc0] sm:$0xff] }
   0xb   :  { %724 = vmatpush3.bf16.msra.mxu1 %v723_v24  ;;  %v78_v42 = vld [vmem:[%s1311_s1 + $0x1b8] sm:$0xff]  ;;  %v61_v43 = vld [vmem:[%s1311_s1 + $0x130] sm:$0xff]  ;;  %v48_v47 = vld [vmem:[%s1311_s1 + $0xc8] sm:$0xff]  ;;  %v699_v48 = vpack.c.bf16 %v30_v39, %v29_v38 }
   0xc   :  { %726 = vmatprep.subr.bf16.mxu1 %v725_v33  ;;  %v729_v44 = vpack.c.bf16 %v78_v42, %v77_v40  ;;  %v62_v45 = vld [vmem:[%s1311_s1 + $0x138] sm:$0xff]  ;;  %v79_v49 = vld [vmem:[%s1311_s1 + $0x1c0] sm:$0xff]  ;;  %v80_v50 = vld [vmem:[%s1311_s1 + $0x1c8] sm:$0xff]  ;;  %v701_v51 = vpack.c.bf16 %v48_v47, %v47_v46 }
   0xd   :  { %696 = vmatpush3.bf16.msra.mxu0 %v695_v32  ;;  %v31_v52 = vld [vmem:[%s1311_s1 + $0x40] sm:$0xff]  ;;  %v32_v53 = vld [vmem:[%s1311_s1 + $0x48] sm:$0xff]  ;;  %v731_v57 = vpack.c.bf16 %v62_v45, %v61_v43  ;;  %v49_v58 = vld [vmem:[%s1311_s1 + $0xd0] sm:$0xff]  ;;  %v733_v60 = vpack.c.bf16 %v80_v50, %v79_v49 }
   0xe   :  { %698 = vmatprep.subr.bf16.mxu0 %v697_v37  ;;  %v50_v59 = vld [vmem:[%s1311_s1 + $0xd8] sm:$0xff]  ;;  %v63_v61 = vld [vmem:[%s1311_s1 + $0x140] sm:$0xff]  ;;  %v64_v62 = vld [vmem:[%s1311_s1 + $0x148] sm:$0xff]  ;;  %v703_v63 = vpack.c.bf16 %v32_v53, %v31_v52 }
   0xf   :  { %728 = vmatpush3.bf16.msra.mxu1 %v727_v41  ;;  %v81_v0 = vld [vmem:[%s1311_s1 + $0x1d0] sm:$0xff]  ;;  %v82_v1 = vld [vmem:[%s1311_s1 + $0x1d8] sm:$0xff]  ;;  %v705_v2 = vpack.c.bf16 %v50_v59, %v49_v58  ;;  %v735_v7 = vpack.c.bf16 %v64_v62, %v63_v61  ;;  %v51_v8 = vld [vmem:[%s1311_s1 + $0xe0] sm:$0xff] }
  0x10   :  { %730 = vmatprep.subr.bf16.mxu1 %v729_v44  ;;  %v33_v3 = vld [vmem:[%s1311_s1 + $0x50] sm:$0xff]  ;;  %v34_v4 = vld [vmem:[%s1311_s1 + $0x58] sm:$0xff]  ;;  %v52_v9 = vld [vmem:[%s1311_s1 + $0xe8] sm:$0xff]  ;;  %v737_v10 = vpack.c.bf16 %v82_v1, %v81_v0 }
  0x11   :  { %700 = vmatpush3.bf16.msra.mxu0 %v699_v48  ;;  %v65_v11 = vld [vmem:[%s1311_s1 + $0x150] sm:$0xff]  ;;  %v66_v12 = vld [vmem:[%s1311_s1 + $0x158] sm:$0xff]  ;;  %v35_v13 = vld [vmem:[%s1311_s1 + $0x60] sm:$0xff]  ;;  %v707_v14 = vpack.c.bf16 %v34_v4, %v33_v3  ;;  %v709_v18 = vpack.c.bf16 %v52_v9, %v51_v8 }
  0x12   :  { %702 = vmatprep.subr.bf16.mxu0 %v701_v51  ;;  %v36_v15 = vld [vmem:[%s1311_s1 + $0x68] sm:$0xff]  ;;  %v83_v16 = vld [vmem:[%s1311_s1 + $0x1e0] sm:$0xff]  ;;  %v53_v21 = vld [vmem:[%s1311_s1 + $0xf0] sm:$0xff]  ;;  %v739_v24 = vpack.c.bf16 %v66_v12, %v65_v11 }
  0x13   :  { %732 = vmatpush3.bf16.msra.mxu1 %v731_v57  ;;  %v84_v17 = vld [vmem:[%s1311_s1 + $0x1e8] sm:$0xff]  ;;  %v67_v19 = vld [vmem:[%s1311_s1 + $0x160] sm:$0xff]  ;;  %v54_v22 = vld [vmem:[%s1311_s1 + $0xf8] sm:$0xff]  ;;  %v711_v29 = vpack.c.bf16 %v36_v15, %v35_v13 }
  0x14   :  { %734 = vmatprep.subr.bf16.mxu1 %v733_v60  ;;  %v68_v20 = vld [vmem:[%s1311_s1 + $0x168] sm:$0xff]  ;;  %v741_v25 = vpack.c.bf16 %v84_v17, %v83_v16  ;;  %v85_v26 = vld [vmem:[%s1311_s1 + $0x1f0] sm:$0xff]  ;;  %v86_v30 = vld [vmem:[%s1311_s1 + $0x1f8] sm:$0xff]  ;;  %v713_v33 = vpack.c.bf16 %v54_v22, %v53_v21 }
  0x15   :  { %704 = vmatpush3.bf16.msra.mxu0 %v703_v63  ;;  %v817_v27 = vld [vmem:[%s1310_s0] ss:$16 sps:$4 sm:$0xff]   ;;  %v821_v31 = vld [vmem:[%s1310_s0 + $0x4] ss:$16 sps:$4 sm:$0xff]   ;;  %v38_v35 = vld [vmem:[%s1311_s1 + $0x78] sm:$0xff]  ;;  %v743_v38 = vpack.c.bf16 %v68_v20, %v67_v19  ;;  %v745_v43 = vpack.c.bf16 %v86_v30, %v85_v26 }
  0x16   :  { %706 = vmatprep.subr.bf16.mxu0 %v705_v2  ;;  %v819_v28 = vld [vmem:[%s1310_s0 + $0x20] ss:$16 sps:$4 sm:$0xff]   ;;  %v822_v32 = vld [vmem:[%s1310_s0 + $0x24] ss:$16 sps:$4 sm:$0xff]   ;;  %v176_v36 = vrot.slane %v817_v27, %v1051_v23  ;;  %v104_v40 = vld [vmem:[%s1311_s1 + $0x288] sm:$0xff]  ;;  %v183_v41 = vrot.slane %v821_v31, %v1051_v23 }
  0x17   :  { %736 = vmatpush3.bf16.msra.mxu1 %v735_v7  ;;  %v37_v34 = vld [vmem:[%s1311_s1 + $0x70] sm:$0xff]  ;;  %v190_v37 = vrot.slane %v819_v28, %v1051_v23  ;;  %v103_v39 = vld [vmem:[%s1311_s1 + $0x280] sm:$0xff]  ;;  %v197_v42 = vrot.slane %v822_v32, %v1051_v23  ;;  %v70_v45 = vld [vmem:[%s1311_s1 + $0x178] sm:$0xff] }
  0x18   :  { %738 = vmatprep.subr.bf16.mxu1 %v737_v10  ;;  %v69_v44 = vld [vmem:[%s1311_s1 + $0x170] sm:$0xff]  ;;  %v715_v47 = vpack.c.bf16 %v38_v35, %v37_v34  ;;  %v135_v49 = vld [vmem:[%s1311_s1 + $0x380] sm:$0xff]  ;;  %v136_v50 = vld [vmem:[%s1311_s1 + $0x388] sm:$0xff]  ;;  %v749_v51 = vpack.c.bf16 %v104_v40, %v103_v39 }
  0x19   :  { %708 = vmatpush3.bf16.msra.mxu0 %v707_v14  ;;  %v199_v46 = vcombine.high %v176_v36, %v190_v37  ;;  %v201_v48 = vcombine.high %v183_v41, %v197_v42  ;;  %v87_v52 = vld [vmem:[%s1311_s1 + $0x200] sm:$0xff]  ;;  %v88_v53 = vld [vmem:[%s1311_s1 + $0x208] sm:$0xff]  ;;  %v747_v54 = vpack.c.bf16 %v70_v45, %v69_v44  ;;  %v105_v55 = vld [vmem:[%s1311_s1 + $0x290] sm:$0xff]  ;;  %v198_v57 = vcombine.low %v176_v36, %v190_v37 }
  0x1a   :  { %710 = vmatprep.subr.bf16.mxu0 %v709_v18  ;;  %v106_v56 = vld [vmem:[%s1311_s1 + $0x298] sm:$0xff]  ;;  %v781_v58 = vpack.c.bf16 %v136_v50, %v135_v49  ;;  %v119_v59 = vld [vmem:[%s1311_s1 + $0x300] sm:$0xff]  ;;  %v120_v60 = vld [vmem:[%s1311_s1 + $0x308] sm:$0xff]  ;;  %v751_v61 = vpack.c.bf16 %v88_v53, %v87_v52  ;;  %v200_v0 = vcombine.low %v183_v41, %v197_v42 }
  0x1b   :  { %740 = vmatpush3.bf16.msra.mxu1 %v739_v24  ;;  %310 = vmatprep.mubr.f32.mxu0 %v199_v46  ;;  %v137_v62 = vld [vmem:[%s1311_s1 + $0x390] sm:$0xff]  ;;  %v138_v63 = vld [vmem:[%s1311_s1 + $0x398] sm:$0xff]  ;;  %v753_v1 = vpack.c.bf16 %v106_v56, %v105_v55  ;;  %v783_v4 = vpack.c.bf16 %v120_v60, %v119_v59  ;;  %v107_v5 = vld [vmem:[%s1311_s1 + $0x2a0] sm:$0xff] }
  0x1c   :  { %742 = vmatprep.subr.bf16.mxu1 %v741_v25  ;;  %380 = vmatprep.mubr.f32.mxu1 %v201_v48  ;;  %v89_v2 = vld [vmem:[%s1311_s1 + $0x210] sm:$0xff]  ;;  %v90_v3 = vld [vmem:[%s1311_s1 + $0x218] sm:$0xff]  ;;  %v108_v6 = vld [vmem:[%s1311_s1 + $0x2a8] sm:$0xff]  ;;  %v785_v7 = vpack.c.bf16 %v138_v63, %v137_v62 }
  0x1d   :  { %712 = vmatpush3.bf16.msra.mxu0 %v711_v29  ;;  %v121_v8 = vld [vmem:[%s1311_s1 + $0x310] sm:$0xff]  ;;  %v122_v9 = vld [vmem:[%s1311_s1 + $0x318] sm:$0xff]  ;;  %v755_v10 = vpack.c.bf16 %v90_v3, %v89_v2  ;;  %v139_v11 = vld [vmem:[%s1311_s1 + $0x3a0] sm:$0xff]  ;;  %v757_v13 = vpack.c.bf16 %v108_v6, %v107_v5 }
  0x1e   :  { %714 = vmatprep.subr.bf16.mxu0 %v713_v33  ;;  %v140_v12 = vld [vmem:[%s1311_s1 + $0x3a8] sm:$0xff]  ;;  %v91_v14 = vld [vmem:[%s1311_s1 + $0x220] sm:$0xff]  ;;  %v787_v16 = vpack.c.bf16 %v122_v9, %v121_v8  ;;  %v109_v17 = vld [vmem:[%s1311_s1 + $0x2b0] sm:$0xff] }
  0x1f   :  { %744 = vmatpush3.bf16.msra.mxu1 %v743_v38  ;;  %v92_v15 = vld [vmem:[%s1311_s1 + $0x228] sm:$0xff]  ;;  %v110_v18 = vld [vmem:[%s1311_s1 + $0x2b8] sm:$0xff]  ;;  %v789_v19 = vpack.c.bf16 %v140_v12, %v139_v11  ;;  %v123_v20 = vld [vmem:[%s1311_s1 + $0x320] sm:$0xff] }
  0x20   :  { %746 = vmatprep.subr.bf16.mxu1 %v745_v43  ;;  %v124_v21 = vld [vmem:[%s1311_s1 + $0x328] sm:$0xff]  ;;  %v759_v22 = vpack.c.bf16 %v92_v15, %v91_v14  ;;  %v141_v24 = vld [vmem:[%s1311_s1 + $0x3b0] sm:$0xff]  ;;  %v142_v25 = vld [vmem:[%s1311_s1 + $0x3b8] sm:$0xff]  ;;  %v761_v26 = vpack.c.bf16 %v110_v18, %v109_v17 }
  0x21   :  { %716 = vmatpush3.bf16.msra.mxu0 %v715_v47  ;;  %v93_v27 = vld [vmem:[%s1311_s1 + $0x230] sm:$0xff]  ;;  %v94_v28 = vld [vmem:[%s1311_s1 + $0x238] sm:$0xff]  ;;  %v791_v29 = vpack.c.bf16 %v124_v21, %v123_v20  ;;  %v111_v30 = vld [vmem:[%s1311_s1 + $0x2c0] sm:$0xff]  ;;  %v793_v32 = vpack.c.bf16 %v142_v25, %v141_v24 }
  0x22   :  { %750 = vmatprep.subr.bf16.mxu0 %v749_v51  ;;  %v112_v31 = vld [vmem:[%s1311_s1 + $0x2c8] sm:$0xff]  ;;  %v125_v33 = vld [vmem:[%s1311_s1 + $0x330] sm:$0xff]  ;;  %v126_v34 = vld [vmem:[%s1311_s1 + $0x338] sm:$0xff]  ;;  %v763_v36 = vpack.c.bf16 %v94_v28, %v93_v27 }
  0x23   :  { %748 = vmatpush3.bf16.msra.mxu1 %v747_v54  ;;  %v95_v35 = vld [vmem:[%s1311_s1 + $0x240] sm:$0xff]  ;;  %v96_v37 = vld [vmem:[%s1311_s1 + $0x248] sm:$0xff]  ;;  %v765_v40 = vpack.c.bf16 %v112_v31, %v111_v30  ;;  %v113_v43 = vld [vmem:[%s1311_s1 + $0x2d0] sm:$0xff]  ;;  %v795_v45 = vpack.c.bf16 %v126_v34, %v125_v33 }
  0x24   :  { %311 = vmatmul.mubr.f32.vlgmr.msra.gmra.mrb[0].mxu0 %v198_v57  ;;  %782 = vmatprep.subr.bf16.mxu1 %v781_v58  ;;  %v143_v38 = vld [vmem:[%s1311_s1 + $0x3c0] sm:$0xff]  ;;  %v144_v39 = vld [vmem:[%s1311_s1 + $0x3c8] sm:$0xff]  ;;  %v114_v44 = vld [vmem:[%s1311_s1 + $0x2d8] sm:$0xff]  ;;  %v767_v50 = vpack.c.bf16 %v96_v37, %v95_v35 }
  0x25   :  { %752 = vmatpush3.bf16.msra.mxu0 %v751_v61  ;;  %v127_v41 = vld [vmem:[%s1311_s1 + $0x340] sm:$0xff]  ;;  %v128_v42 = vld [vmem:[%s1311_s1 + $0x348] sm:$0xff]  ;;  %v797_v46 = vpack.c.bf16 %v144_v39, %v143_v38  ;;  %v145_v51 = vld [vmem:[%s1311_s1 + $0x3d0] sm:$0xff]  ;;  %v769_v54 = vpack.c.bf16 %v114_v44, %v113_v43 }
  0x26   :  { %381 = vmatmul.mubr.f32.vlgmr.msra.gmra.mrb[0].mxu1 %v200_v0  ;;  %754 = vmatprep.subr.bf16.mxu0 %v753_v1  ;;  %v823_v47 = vld [vmem:[%s1310_s0 + $0x8] ss:$16 sps:$4 sm:$0xff]   ;;  %v827_v49 = vld [vmem:[%s1310_s0 + $0xc] ss:$16 sps:$4 sm:$0xff]   ;;  %v97_v55 = vld [vmem:[%s1311_s1 + $0x250] sm:$0xff]  ;;  %v799_v60 = vpack.c.bf16 %v128_v42, %v127_v41 }
  0x27   :  { %784 = vmatpush3.bf16.msra.mxu1 %v783_v4  ;;  %v825_v48 = vld [vmem:[%s1310_s0 + $0x28] ss:$16 sps:$4 sm:$0xff]   ;;  %v828_v53 = vld [vmem:[%s1310_s0 + $0x2c] ss:$16 sps:$4 sm:$0xff]   ;;  %v212_v57 = vrot.slane %v823_v47, %v1051_v23  ;;  %v219_v59 = vrot.slane %v827_v49, %v1051_v23  ;;  %v115_v61 = vld [vmem:[%s1311_s1 + $0x2e0] sm:$0xff] }
  0x28   :  { %786 = vmatprep.subr.bf16.mxu1 %v785_v7  ;;  %v146_v52 = vld [vmem:[%s1311_s1 + $0x3d8] sm:$0xff]  ;;  %v226_v58 = vrot.slane %v825_v48, %v1051_v23  ;;  %v116_v62 = vld [vmem:[%s1311_s1 + $0x2e8] sm:$0xff]  ;;  %v233_v63 = vrot.slane %v828_v53, %v1051_v23  ;;  %v129_v1 = vld [vmem:[%s1311_s1 + $0x350] sm:$0xff] }
  0x29   :  { %756 = vmatpush3.bf16.msra.mxu0 %v755_v10  ;;  %v98_v56 = vld [vmem:[%s1311_s1 + $0x258] sm:$0xff]  ;;  %v801_v0 = vpack.c.bf16 %v146_v52, %v145_v51  ;;  %v147_v5 = vld [vmem:[%s1311_s1 + $0x3e0] sm:$0xff]  ;;  %v148_v23 = vld [vmem:[%s1311_s1 + $0x3e8] sm:$0xff]  ;;  %v773_v7 = vpack.c.bf16 %v116_v62, %v115_v61 }
  0x2a   :  { %758 = vmatprep.subr.bf16.mxu0 %v757_v13  ;;  %v130_v2 = vld [vmem:[%s1311_s1 + $0x358] sm:$0xff]  ;;  %v235_v3 = vcombine.high %v212_v57, %v226_v58  ;;  %v771_v4 = vpack.c.bf16 %v98_v56, %v97_v55  ;;  %v237_v6 = vcombine.high %v219_v59, %v233_v63  ;;  %v99_v8 = vld [vmem:[%s1311_s1 + $0x260] sm:$0xff]  ;;  %v100_v9 = vld [vmem:[%s1311_s1 + $0x268] sm:$0xff]  ;;  %v805_v13 = vpack.c.bf16 %v148_v23, %v147_v5 }
  0x2b   :  { %788 = vmatpush3.bf16.msra.mxu1 %v787_v16  ;;  %v803_v10 = vpack.c.bf16 %v130_v2, %v129_v1  ;;  %v117_v11 = vld [vmem:[%s1311_s1 + $0x2f0] sm:$0xff]  ;;  %v118_v12 = vld [vmem:[%s1311_s1 + $0x2f8] sm:$0xff]  ;;  %v131_v14 = vld [vmem:[%s1311_s1 + $0x360] sm:$0xff]  ;;  %v775_v16 = vpack.c.bf16 %v100_v9, %v99_v8  ;;  %v236_v30 = vcombine.low %v219_v59, %v233_v63 }
  0x2c   :  { %790 = vmatprep.subr.bf16.mxu1 %v789_v19  ;;  %450 = vmatprep.mubr.f32.mxu0 %v235_v3  ;;  %v132_v15 = vld [vmem:[%s1311_s1 + $0x368] sm:$0xff]  ;;  %v149_v17 = vld [vmem:[%s1311_s1 + $0x3f0] sm:$0xff]  ;;  %v150_v18 = vld [vmem:[%s1311_s1 + $0x3f8] sm:$0xff]  ;;  %v777_v19 = vpack.c.bf16 %v118_v12, %v117_v11 }
  0x2d   :  { %760 = vmatpush3.bf16.msra.mxu0 %v759_v22  ;;  %520 = vmatprep.mubr.f32.mxu1 %v237_v6  ;;  %v101_v20 = vld [vmem:[%s1311_s1 + $0x270] sm:$0xff]  ;;  %v102_v21 = vld [vmem:[%s1311_s1 + $0x278] sm:$0xff]  ;;  %v807_v22 = vpack.c.bf16 %v132_v15, %v131_v14  ;;  %v809_v24 = vpack.c.bf16 %v150_v18, %v149_v17 }
  0x2e   :  { %762 = vmatprep.subr.bf16.mxu0 %v761_v26  ;;  %v133_v25 = vld [vmem:[%s1311_s1 + $0x370] sm:$0xff]  ;;  %v134_v26 = vld [vmem:[%s1311_s1 + $0x378] sm:$0xff]  ;;  %v779_v27 = vpack.c.bf16 %v102_v21, %v101_v20 }
  0x2f   :  { %792 = vmatpush3.bf16.msra.mxu1 %v791_v29  ;;  %v811_v28 = vpack.c.bf16 %v134_v26, %v133_v25  ;;  %v234_v29 = vcombine.low %v212_v57, %v226_v58 }
  0x30   :  { %794 = vmatprep.subr.bf16.mxu1 %v793_v32  ;;  %v544_v32 = vld [vmem:[%s1312_s2] ss:$0 sm:$0xff] }
  0x31   :  { %764 = vmatpush3.bf16.msra.mxu0 %v763_v36 }
  0x32   :  { %766 = vmatprep.subr.bf16.mxu0 %v765_v40 }
  0x33   :  { %796 = vmatpush3.bf16.msra.mxu1 %v795_v45 }
  0x34   :  { %798 = vmatprep.subr.bf16.mxu1 %v797_v46 }
  0x35   :  { %768 = vmatpush3.bf16.msra.mxu0 %v767_v50 }
  0x36   :  { %770 = vmatprep.subr.bf16.mxu0 %v769_v54 }
  0x37   :  { %800 = vmatpush3.bf16.msra.mxu1 %v799_v60 }
  0x38   :  { %802 = vmatprep.subr.bf16.mxu1 %v801_v0 }
  0x39   :  { %772 = vmatpush3.bf16.msra.mxu0 %v771_v4 }
  0x3a   :  { %774 = vmatprep.subr.bf16.mxu0 %v773_v7 }
  0x3b   :  { %804 = vmatpush3.bf16.msra.mxu1 %v803_v10 }
  0x3c   :  { %806 = vmatprep.subr.bf16.mxu1 %v805_v13 }
  0x3d   :  { %776 = vmatpush3.bf16.msra.mxu0 %v775_v16 }
  0x3e   :  { %778 = vmatprep.subr.bf16.mxu0 %v777_v19 }
  0x3f   :  { %808 = vmatpush3.bf16.msra.mxu1 %v807_v22 }
  0x40   :  { %810 = vmatprep.subr.bf16.mxu1 %v809_v24 }
  0x41   :  { %780 = vmatpush3.bf16.msra.mxu0 %v779_v27 }
  0x43   :  { %812 = vmatpush3.bf16.msra.mxu1 %v811_v28 }
  0x44   :  { %451 = vmatmul.mubr.f32.vlgmr.msra.gmra.mrb[2].mxu0 %v234_v29 }
  0x46   :  { %521 = vmatmul.mubr.f32.vlgmr.msra.gmra.mrb[2].mxu1 %v236_v30 }
  0xf7   :  { %v577_v31 = vpop.f32.mrb[0].mxu0 }
  0xf8   :  { %v578_v33 = vpop.f32.mrb[1].mxu0 }
  0xf9   :  { %v579_v34 = vadd.f32 %v578_v33, %v577_v31  ;;  %v612_v35 = vpop.f32.mrb[0].mxu1 }
  0xfa   :  { %v613_v36 = vpop.f32.mrb[1].mxu1 }
  0xfb   :  { %v313_v37 = vadd.f32 %v579_v34, %v544_v32  ;;  %v614_v38 = vadd.f32 %v613_v36, %v612_v35 }
  0xfd   :  { %v383_v39 = vadd.f32 %v614_v38, %v313_v37 }
 0x117   :  { %v647_v40 = vpop.f32.mrb[2].mxu0 }
 0x118   :  { %v648_v41 = vpop.f32.mrb[3].mxu0 }
 0x119   :  { %v649_v42 = vadd.f32 %v648_v41, %v647_v40  ;;  %v682_v43 = vpop.f32.mrb[2].mxu1 }
 0x11a   :  { %v683_v44 = vpop.f32.mrb[3].mxu1 }
 0x11b   :  { %v453_v45 = vadd.f32 %v649_v42, %v383_v39  ;;  %v684_v46 = vadd.f32 %v683_v44, %v682_v43 }
 0x11d   :  { %v523_v47 = vadd.f32 %v684_v46, %v453_v45 }
 0x11f   :  { %527 = vst.msk [vmem:[#allocation2] sm:$0xff] %vm526_vm0, %v523_v47 }
 0x120   :  { %532 = vsyncadd [#allocation3], 96  ;;  %s854_s1 = smov [#allocation2]  }
 0x121   :  { %s533_s2 = sshll.u32 %s854_s1, 4  ;;  %s534_s2 = int_to_ptr.vmem [resolvable:$true] %s533_s2 }
 0x122   :  { %s829_s14 = scalar_lea.vmem %s534_s2, 32  ;;  %s833_s15 = scalar_lea.vmem %s534_s2, 128 }
 0x123   :  { %p830_p0 = scmp.ne.s32.totalorder %s534_s2, %s829_s14  ;;  %p834_p1 = scmp.lt.s32.totalorder %s534_s2, %s534_s2 }
 0x124   :  { %p835_p2 = scmp.lt.s32.totalorder %s833_s15, %s829_s14 }
 0x126   :  { %p836_p3 = por %p835_p2, %p834_p1 }
 0x128   :  { %p837_p4 = pnand %p836_p3, %p830_p0 }
 0x12a   :  { %840 = shalt.err (!%p837_p4)
}
 0x12b   :  { %s841_s18 = scalar_lea.hbm %s1313_s3, 32 }
 0x12c   :  { %p842_p5 = scmp.ne.s32.totalorder %s1313_s3, %s841_s18  ;;  %p845_p6 = scmp.lt.u32.totalorder %s841_s18, %s1313_s3 }
 0x12e   :  { %p847_p7 = pnand %p845_p6, %p842_p5 }
 0x130   :  { %850 = shalt.err (!%p847_p7)
}
 0x131   :  { %s855_s23 = smov 32   ;;  %s856_s24 = smov 2  }
 0x132   :  { %539 = dma.vmem_to_hbm [thread:$0]  %s534_s2, 32, %s1313_s3, [#allocation3], %s855_s23, %s855_s23, %s856_s24  }
 0x133   :  { %851 = dma.done.wait [#allocation3], 128  }
 0x134   :  { %852 = vsyncadd [#allocation3], 4294967168 }
 0x135   :  { %543 = vsyncpa [#allocation3], 1 }

</bundles_post_ra>
